<compile_context>
chip_gen: v5e
topology: v5e:2x2
jax: 0.10.0
libtpu: 0.0.40
codegen_flags: <defaults>
</compile_context>

<pallas_src>
import functools

import jax
import jax.numpy as jnp
from jax.experimental import pallas as pl
from jax.experimental.pallas import tpu as pltpu


def _round_up(x, m):
    return ((x + m - 1) // m) * m


def _max_avg_pool_kernel(x_ref, o_ref, sum_ref, max_ref, *,
                         hw_true, hw_tile, needs_mask):
    """One (row_tile, hw_tile) chunk of the fused (B*C, H*W) input.

    x_ref:   (row_tile, hw_tile) input chunk (input dtype)
    o_ref:   (row_tile, 1) output block (written only on the last k step)
    sum_ref: (row_tile, 1) f32 running sum scratch
    max_ref: (row_tile, 1) running max scratch (input dtype)
    """
    k = pl.program_id(1)

    @pl.when(k == 0)
    def _init():
        sum_ref[...] = jnp.zeros_like(sum_ref)
        max_ref[...] = jnp.full_like(max_ref, -jnp.inf)

    x = x_ref[...]                                     # (row_tile, hw_tile)

    if needs_mask:
        # Tail spatial chunk: identity 0 for the sum, -inf for the max.
        col = k * hw_tile + jax.lax.broadcasted_iota(jnp.int32, x.shape, 1)
        valid = col < hw_true
        x_sum = jnp.where(valid, x, 0).astype(jnp.float32)
        x_max = jnp.where(valid, x, -jnp.inf)
    else:
        x_sum = x.astype(jnp.float32)
        x_max = x

    sum_ref[...] += jnp.sum(x_sum, axis=-1, keepdims=True)
    max_ref[...] = jnp.maximum(max_ref[...],
                               jnp.max(x_max, axis=-1, keepdims=True))

    @pl.when(k == pl.num_programs(1) - 1)
    def _finalize():
        avg = sum_ref[...] * (1.0 / hw_true)           # divide by TRUE H*W
        o_ref[...] = (avg + max_ref[...].astype(jnp.float32)).astype(o_ref.dtype)


def max_avg_pool(x, *, row_tile=None, hw_tile=None):
    """x: (B, C, H, W) -> (B, C) = per-channel spatial mean + spatial max."""
    B, C, H, W = x.shape
    R, HW = B * C, H * W
    x2 = x.reshape(R, HW)                              # fuse batch & channel rows

    # Row tile: multiple of 8 sublanes, capped at 256.
    if row_tile is None:
        row_tile = min(256, _round_up(R, 8))
    # Spatial tile: multiple of 128 lanes, capped so a double-buffered f32
    # input tile is <= ~4 MiB (256 * 2048 * 4 B * 2 bufs) — safe on v7x too.
    if hw_tile is None:
        hw_tile = min(_round_up(HW, 128), 2048)

    r_pad = _round_up(R, row_tile)
    hw_pad = _round_up(HW, hw_tile)
    if (r_pad, hw_pad) != (R, HW):
        x2 = jnp.pad(x2, ((0, r_pad - R), (0, hw_pad - HW)))

    n_rt = r_pad // row_tile
    n_kt = hw_pad // hw_tile

    kernel = functools.partial(
        _max_avg_pool_kernel,
        hw_true=HW, hw_tile=hw_tile, needs_mask=(hw_pad != HW))

    itemsize = jnp.dtype(x.dtype).itemsize
    out = pl.pallas_call(
        kernel,
        out_shape=jax.ShapeDtypeStruct((r_pad, 1), x.dtype),
        grid_spec=pltpu.PrefetchScalarGridSpec(
            num_scalar_prefetch=0,
            grid=(n_rt, n_kt),                          # reduction axis last
            in_specs=[
                pl.BlockSpec((row_tile, hw_tile), lambda i, k: (i, k)),
            ],
            out_specs=pl.BlockSpec((row_tile, 1), lambda i, k: (i, 0)),
            scratch_shapes=[
                pltpu.VMEM((row_tile, 1), jnp.float32),  # running sum (f32)
                pltpu.VMEM((row_tile, 1), x.dtype),      # running max (in dtype)
            ],
        ),
        compiler_params=pltpu.CompilerParams(
            dimension_semantics=("parallel", "arbitrary"),
        ),
        cost_estimate=pl.CostEstimate(
            flops=2 * R * HW,
            transcendentals=0,
            bytes_accessed=R * HW * itemsize + R * itemsize,
        ),
    )(x2)

    return out[:R, 0].reshape(B, C)


def _reference(x):
    return jnp.mean(x, axis=(2, 3)) + jnp.max(x, axis=(2, 3))


if __name__ == "__main__":
    key = jax.random.PRNGKey(0)

    # Primary case (shapes implied by the module's forward).
    B, C, H, W = 2, 4, 16, 16
    x = jax.random.normal(key, (B, C, H, W), dtype=jnp.float32)
    out = jax.block_until_ready(max_avg_pool(x))
    ref = _reference(x)
    assert out.shape == (B, C), out.shape
    assert jnp.allclose(out, ref, atol=1e-5, rtol=1e-5), (out, ref)

    # Exercise the chunked-reduction path (multiple k steps over H*W).
    out2 = jax.block_until_ready(max_avg_pool(x, hw_tile=128))
    assert jnp.allclose(out2, ref, atol=1e-5, rtol=1e-5), (out2, ref)

    # Exercise row padding + spatial tail masking (C not mult of 8, H*W=49).
    k2 = jax.random.PRNGKey(1)
    x3 = jax.random.normal(k2, (2, 3, 7, 7), dtype=jnp.float32) - 2.0  # all-ish negative
    out3 = jax.block_until_ready(max_avg_pool(x3))
    ref3 = _reference(x3)
    assert jnp.allclose(out3, ref3, atol=1e-5, rtol=1e-5), (out3, ref3)

    print("KERNEL_OK")
</pallas_src>

<mosaic_0001>
module attributes {stable_mosaic.version = 11 : i64} {
  func.func @_max_avg_pool_kernel(%arg0: i32, %arg1: i32, %arg2: memref<8x256xf32, #tpu.memory_space<vmem>>, %arg3: memref<8x1xf32, #tpu.memory_space<vmem>>, %arg4: memref<8x1xf32, #tpu.memory_space<vmem>>, %arg5: memref<8x1xf32, #tpu.memory_space<vmem>>) attributes {dimension_semantics = [#tpu.dimension_semantics<parallel>, #tpu.dimension_semantics<arbitrary>], iteration_bounds = array<i64: 1, 1>, scalar_prefetch = 0 : i64, scratch_operands = 2 : i64, tpu.core_type = #tpu.core_type<tc>, window_params = [{transform_indices = @transform_0, window_bounds = array<i64: 8, 256>}, {transform_indices = @transform_1, window_bounds = array<i64: 8, 1>}]} {
    %c0_i32 = arith.constant 0 : i32
    %0 = arith.cmpi eq, %arg1, %c0_i32 : i32
    %1 = arith.extui %0 : i1 to i32
    %c0_i32_0 = arith.constant 0 : i32
    %2 = arith.cmpi ne, %1, %c0_i32_0 : i32
    scf.if %2 {
      %cst_13 = arith.constant 0.000000e+00 : f32
      %17 = vector.broadcast %cst_13 : f32 to vector<8x1xf32>
      %c0_14 = arith.constant 0 : index
      %c0_15 = arith.constant 0 : index
      %18 = vector.load %arg4[%c0_14, %c0_15] : memref<8x1xf32, #tpu.memory_space<vmem>>, vector<8x1xf32>
      tpu.vector_store %arg4[%c0_14, %c0_15], %17 {strides = array<i32>} : memref<8x1xf32, #tpu.memory_space<vmem>>, vector<8x1xf32>,
      %cst_16 = arith.constant 0xFF800000 : f32
      %19 = vector.broadcast %cst_16 : f32 to vector<8x1xf32>
      %c0_17 = arith.constant 0 : index
      %c0_18 = arith.constant 0 : index
      %20 = vector.load %arg5[%c0_17, %c0_18] : memref<8x1xf32, #tpu.memory_space<vmem>>, vector<8x1xf32>
      tpu.vector_store %arg5[%c0_17, %c0_18], %19 {strides = array<i32>} : memref<8x1xf32, #tpu.memory_space<vmem>>, vector<8x1xf32>,
    } else {
    }
    %c0 = arith.constant 0 : index
    %c0_1 = arith.constant 0 : index
    %3 = vector.load %arg2[%c0, %c0_1] : memref<8x256xf32, #tpu.memory_space<vmem>>, vector<8x256xf32>
    %c0_2 = arith.constant 0 : index
    %c0_3 = arith.constant 0 : index
    %4 = vector.load %arg4[%c0_2, %c0_3] : memref<8x1xf32, #tpu.memory_space<vmem>>, vector<8x1xf32>
    %cst = arith.constant dense<0.000000e+00> : vector<8xf32>
    %5 = vector.multi_reduction <add>, %3, %cst [1] : vector<8x256xf32> to vector<8xf32>
    %6 = vector.shape_cast %5 : vector<8xf32> to vector<8x1xf32>
    %7 = arith.addf %4, %6 : vector<8x1xf32>
    %c0_4 = arith.constant 0 : index
    %c0_5 = arith.constant 0 : index
    %8 = vector.load %arg4[%c0_4, %c0_5] : memref<8x1xf32, #tpu.memory_space<vmem>>, vector<8x1xf32>
    tpu.vector_store %arg4[%c0_4, %c0_5], %7 {strides = array<i32>} : memref<8x1xf32, #tpu.memory_space<vmem>>, vector<8x1xf32>,
    %c0_6 = arith.constant 0 : index
    %c0_7 = arith.constant 0 : index
    %9 = vector.load %arg5[%c0_6, %c0_7] : memref<8x1xf32, #tpu.memory_space<vmem>>, vector<8x1xf32>
    %cst_8 = arith.constant dense<0xFF800000> : vector<8xf32>
    %10 = vector.multi_reduction <maximumf>, %3, %cst_8 [1] : vector<8x256xf32> to vector<8xf32>
    %11 = vector.shape_cast %10 : vector<8xf32> to vector<8x1xf32>
    %12 = arith.maximumf %9, %11 : vector<8x1xf32>
    %c0_9 = arith.constant 0 : index
    %c0_10 = arith.constant 0 : index
    %13 = vector.load %arg5[%c0_9, %c0_10] : memref<8x1xf32, #tpu.memory_space<vmem>>, vector<8x1xf32>
    tpu.vector_store %arg5[%c0_9, %c0_10], %12 {strides = array<i32>} : memref<8x1xf32, #tpu.memory_space<vmem>>, vector<8x1xf32>,
    %c0_i32_11 = arith.constant 0 : i32
    %14 = arith.cmpi eq, %arg1, %c0_i32_11 : i32
    %15 = arith.extui %14 : i1 to i32
    %c0_i32_12 = arith.constant 0 : i32
    %16 = arith.cmpi ne, %15, %c0_i32_12 : i32
    scf.if %16 {
      %c0_13 = arith.constant 0 : index
      %c0_14 = arith.constant 0 : index
      %17 = vector.load %arg4[%c0_13, %c0_14] : memref<8x1xf32, #tpu.memory_space<vmem>>, vector<8x1xf32>
      %cst_15 = arith.constant 3.906250e-03 : f32
      %18 = vector.broadcast %cst_15 : f32 to vector<8x1xf32>
      %19 = arith.mulf %17, %18 : vector<8x1xf32>
      %c0_16 = arith.constant 0 : index
      %c0_17 = arith.constant 0 : index
      %20 = vector.load %arg5[%c0_16, %c0_17] : memref<8x1xf32, #tpu.memory_space<vmem>>, vector<8x1xf32>
      %21 = arith.addf %19, %20 : vector<8x1xf32>
      %c0_18 = arith.constant 0 : index
      %c0_19 = arith.constant 0 : index
      %22 = vector.load %arg3[%c0_18, %c0_19] : memref<8x1xf32, #tpu.memory_space<vmem>>, vector<8x1xf32>
      tpu.vector_store %arg3[%c0_18, %c0_19], %21 {strides = array<i32>} : memref<8x1xf32, #tpu.memory_space<vmem>>, vector<8x1xf32>,
    } else {
    }
    return
  }
  func.func @transform_0(%arg0: i32, %arg1: i32) -> (i32, i32) {
    %c0_i32 = arith.constant 0 : i32
    return %arg0, %arg1 : i32, i32
  }
  func.func @transform_1(%arg0: i32, %arg1: i32) -> (i32, i32) {
    %c0_i32 = arith.constant 0 : i32
    %c0_i32_0 = arith.constant 0 : i32
    return %arg0, %c0_i32 : i32, i32
  }
}

</mosaic_0001>

<bundles_post_ra>
// kernel: tpu_custom_call.1
= control target key start
LH: loop header
LB: loop body
LE: loop exit
PB: predicated region body
PF: predicated region fallthrough
CT: control target
= control target key end

     0   :  { %6 = vsyncpa [#allocation5], 0  ;;  %s86_s9 = smov [#allocation4]   ;;  %s110_s0 = inlined_call_operand.hbm [shape: f32[8,256], index: 0, kind: input, shape index: {}]   ;;  %s111_s1 = inlined_call_operand.vmem [shape: f32[8,1], index: 1, kind: output, shape index: {}]  }
   0x1   :  { %s12_s8 = sshll.u32 %s110_s0, 4  ;;  %s14_s10 = sshll.u32 %s86_s9, 4  ;;  %s13_s8 = int_to_ptr.hbm [resolvable:$true] %s12_s8  ;;  %s15_s10 = int_to_ptr.vmem [resolvable:$true] %s14_s10 }
   0x2   :  { %17 = dma.hbm_to_vmem [thread:$0]  %s13_s8, 256, %s15_s10, [#allocation5]  }
   0x3   :  { %84 = dma.done.wait [#allocation5], 256  }
   0x4   :  { %85 = vsyncadd [#allocation5], 4294967040  ;;  %vm26_vm0 = vcmask 7168   ;;  %v87_v0 = vmov 0.0   ;;  %v29_v1 = vld [vmem:[#allocation4] sm:$0xff]  ;;  %v30_v2 = vld [vmem:[#allocation4 + $0x8] sm:$0xff] }
   0x5   :  { %27 = vst.msk [vmem:[#allocation2] sm:$0xff] %vm26_vm0, %v87_v0  ;;  %v32_v3 = vadd.f32 %v30_v2, %v29_v1  ;;  %v39_v4 = vmax.f32 %v29_v1, %v30_v2  ;;  %v88_v5 = vmov -inf  }
   0x6   :  { %28 = vst.msk [vmem:[#allocation3] sm:$0xff] %vm26_vm0, %v88_v5 }
   0x7   :  { %33 = vadd.xlane.f32.xlu0 %v32_v3 }
   0xc   :  { %v31_v6 = vld [vmem:[#allocation2] sm:$0xff] }
   0xd   :  { %v38_v9 = vld [vmem:[#allocation3] sm:$0xff] }
   0xf   :  { %40 = vmax.xlane.f32.xlu0 %v39_v4 }
  0x7a   :  { %v34_v7 = vpop.xlane.xlu0 %33 }
  0x7b   :  { %v35_v8 = vadd.f32 %v34_v7, %v31_v6 }
  0x7d   :  { %37 = vst.msk [vmem:[#allocation2] sm:$0xff] %vm26_vm0, %v35_v8 }
  0x82   :  { %v41_v10 = vpop.xlane.xlu0 %40 }
  0x83   :  { %v42_v11 = vmax.f32 %v38_v9, %v41_v10 }
  0x84   :  { %v47_v12 = vld [vmem:[#allocation2] sm:$0xff] }
  0x85   :  { %43 = vst.msk [vmem:[#allocation3] sm:$0xff] %vm26_vm0, %v42_v11  ;;  %v48_v13 = vmul.f32 0.00390625, %v47_v12 }
  0x8c   :  { %v49_v14 = vld [vmem:[#allocation3] sm:$0xff] }
  0x8d   :  { %v50_v15 = vadd.f32 %v49_v14, %v48_v13 }
  0x8f   :  { %51 = vst.msk [vmem:[%s111_s1] sm:$0xff] %vm26_vm0, %v50_v15 }
  0x90   :  { %56 = vsyncpa [#allocation5], 1 }

</bundles_post_ra>
